<compile_context>
chip_gen: v5e
topology: v5e:2x2
jax: 0.10.0
libtpu: 0.0.40
codegen_flags: <defaults>
</compile_context>

<pallas_src>
import functools

import jax
import jax.numpy as jnp
from jax.experimental import pallas as pl
from jax.experimental.pallas import tpu as pltpu


def _router_kernel(x_ref, wt_ref, rw_ref, idx_ref, logits_ref, probs_ref,
                   *, top_k: int):
    x = x_ref[...]                      # (tT, H)  compute dtype (bf16/f32)
    wt = wt_ref[...]                    # (H, E)   compute dtype

    # --- gate projection (MXU, f32 accumulation) ---
    logits = jnp.dot(x, wt, preferred_element_type=jnp.float32)   # (tT, E) f32
    logits_ref[...] = logits

    # --- softmax over experts (VPU + EUP) ---
    m = jnp.max(logits, axis=-1, keepdims=True)
    e = jnp.exp(logits - m)
    denom = jnp.sum(e, axis=-1, keepdims=True)
    probs = e * pl.reciprocal(denom, approx=True)                 # EUP recip
    probs_ref[...] = probs

    # --- top-k in transposed (E, tT) layout: token axis on lanes ---
    # One XLU transpose; reductions become (short) sublane reductions and the
    # rw/idx stores are lane-dense full vst.
    pt = probs.T                                                  # (E, tT)
    num_e, _tt = pt.shape
    sub_ids = jax.lax.broadcasted_iota(jnp.int32, pt.shape, 0).astype(jnp.float32)

    work = pt
    vals = []
    idxs = []
    for _ in range(top_k):
        mx = jnp.max(work, axis=0, keepdims=True)                 # (1, tT)
        is_max = work == mx
        # first-occurrence index of the max (matches torch.topk tie-break);
        # kept in f32 (exact for small integer values) to stay on float reduce.
        sel = jnp.min(jnp.where(is_max, sub_ids, float(num_e)),
                      axis=0, keepdims=True)                      # (1, tT)
        vals.append(mx)
        idxs.append(sel)
        # finite sentinel: probs are >= 0, so -1.0 is strictly below all of them
        work = jnp.where(sub_ids == sel, -1.0, work)

    top_v = jnp.concatenate(vals, axis=0)                         # (K, tT) f32
    top_i = jnp.concatenate(idxs, axis=0)                         # (K, tT) f32

    s = jnp.sum(top_v, axis=0, keepdims=True) + 1e-6
    rw_ref[...] = top_v * pl.reciprocal(s, approx=True)
    idx_ref[...] = top_i.astype(jnp.int32)


def _vmem_limit_bytes(tokens_tile, H, E, top_k, in_itemsize):
    x_blk = tokens_tile * H * in_itemsize
    w_blk = H * E * in_itemsize
    o_blk = 2 * tokens_tile * E * 4 + 2 * top_k * tokens_tile * 4
    est = 2 * (x_blk + w_blk + o_blk)          # double-buffered pipeline
    est = 2 * est + (4 << 20)                  # headroom for compiler temps
    # NOTE(v7x): physical VMEM is 64 MiB per TensorCore -- choose tokens_tile /
    # bf16 inputs so this stays well below that.  v6e/v5e have 128 MiB.
    return int(min(max(est, 32 << 20), 100 << 20))


def top_k_gating_router(x, gate_weight, *, top_k: int = 2,
                        tokens_tile: int = 256,
                        compute_dtype=jnp.bfloat16):
    """Eval-mode forward of TopKGatingRouter.

    x:            [B, S, H]
    gate_weight:  [E, H]  (torch nn.Linear layout)
    Returns (routing_weights [B,S,K], expert_indices [B,S,K], aux_outputs).
    """
    B, S, H = x.shape
    E = gate_weight.shape[0]
    T = B * S
    assert tokens_tile % 128 == 0, "tokens_tile must be a multiple of 128"

    # pad the token axis so callers don't need T % tokens_tile == 0
    T_pad = ((T + tokens_tile - 1) // tokens_tile) * tokens_tile
    x_flat = x.reshape(T, H).astype(compute_dtype)
    if T_pad != T:
        x_flat = jnp.pad(x_flat, ((0, T_pad - T), (0, 0)))
    w_t = jnp.transpose(gate_weight).astype(compute_dtype)        # (H, E)

    kernel = functools.partial(_router_kernel, top_k=top_k)
    grid = (T_pad // tokens_tile,)

    out_shapes = (
        jax.ShapeDtypeStruct((top_k, T_pad), jnp.float32),   # routing weights (lane-dense)
        jax.ShapeDtypeStruct((top_k, T_pad), jnp.int32),     # expert indices  (lane-dense)
        jax.ShapeDtypeStruct((T_pad, E), jnp.float32),       # gate logits
        jax.ShapeDtypeStruct((T_pad, E), jnp.float32),       # routing probs
    )

    rw_t, idx_t, logits, probs = pl.pallas_call(
        kernel,
        out_shape=out_shapes,
        grid_spec=pltpu.PrefetchScalarGridSpec(
            num_scalar_prefetch=0,
            grid=grid,
            in_specs=[
                pl.BlockSpec((tokens_tile, H), lambda i: (i, 0)),
                pl.BlockSpec((H, E), lambda i: (0, 0)),
            ],
            out_specs=[
                pl.BlockSpec((top_k, tokens_tile), lambda i: (0, i)),
                pl.BlockSpec((top_k, tokens_tile), lambda i: (0, i)),
                pl.BlockSpec((tokens_tile, E), lambda i: (i, 0)),
                pl.BlockSpec((tokens_tile, E), lambda i: (i, 0)),
            ],
        ),
        compiler_params=pltpu.CompilerParams(
            dimension_semantics=("parallel",),   # shards token tiles across TCs
            vmem_limit_bytes=_vmem_limit_bytes(
                tokens_tile, H, E, top_k, jnp.dtype(compute_dtype).itemsize),
        ),
    )(x_flat, w_t)

    routing_weights = rw_t.T[:T].reshape(B, S, top_k)
    expert_indices = idx_t.T[:T].reshape(B, S, top_k)
    aux_outputs = {
        "gate_logits": logits[:T],       # [B*S, E], same as PyTorch
        "routing_probs": probs[:T],      # [B*S, E]
        "aux_loss": jnp.asarray(0.0, dtype=x.dtype),  # eval-mode value
    }
    return routing_weights, expert_indices, aux_outputs


def _reference(x, gate_weight, top_k, compute_dtype=jnp.float32):
    B, S, H = x.shape
    xf = x.reshape(-1, H).astype(compute_dtype)
    w = gate_weight.astype(compute_dtype)
    logits = jnp.dot(xf, w.T, preferred_element_type=jnp.float32)
    probs = jax.nn.softmax(logits, axis=-1)
    tv, ti = jax.lax.top_k(probs, top_k)
    tvn = tv / (jnp.sum(tv, axis=-1, keepdims=True) + 1e-6)
    return tvn.reshape(B, S, top_k), ti.reshape(B, S, top_k), logits, probs


if __name__ == "__main__":
    B, S, H, E, K = 2, 8, 32, 8, 2

    key = jax.random.PRNGKey(0)
    kx, kw = jax.random.split(key)
    x = jax.random.normal(kx, (B, S, H), dtype=jnp.float32)
    # deterministic gate weight, torch nn.Linear layout [num_experts, hidden]
    gate_weight = (jax.random.uniform(kw, (E, H), dtype=jnp.float32) - 0.5) \
        * (2.0 / jnp.sqrt(H))

    # --- f32 path: tight validation against the pure-JAX reference ---
    rw, idx, aux = top_k_gating_router(x, gate_weight, top_k=K,
                                       tokens_tile=256,
                                       compute_dtype=jnp.float32)
    jax.block_until_ready((rw, idx, aux["gate_logits"], aux["routing_probs"]))

    rw_ref, idx_ref, logits_ref, probs_ref = _reference(x, gate_weight, K,
                                                        jnp.float32)
    assert jnp.allclose(rw, rw_ref, atol=2e-3), "routing weights mismatch"
    assert jnp.array_equal(idx, idx_ref), "expert indices mismatch"
    assert jnp.allclose(aux["gate_logits"], logits_ref, atol=1e-4)
    assert jnp.allclose(aux["routing_probs"], probs_ref, atol=2e-3)

    # --- default fast path: bf16 activations/weights, f32 accumulation ---
    rw_b, idx_b, aux_b = top_k_gating_router(x, gate_weight, top_k=K)
    jax.block_until_ready((rw_b, idx_b, aux_b["gate_logits"]))

    rw_bref, _, logits_bref, probs_bref = _reference(x, gate_weight, K,
                                                     jnp.bfloat16)
    assert jnp.allclose(rw_b, rw_bref, atol=1e-2), "bf16 routing weights mismatch"
    assert jnp.allclose(aux_b["gate_logits"], logits_bref, atol=2e-2)
    assert jnp.allclose(aux_b["routing_probs"], probs_bref, atol=1e-2)

    print("KERNEL_OK")
</pallas_src>

<mosaic_0001>
module attributes {stable_mosaic.version = 11 : i64} {
  func.func @_router_kernel(%arg0: i32, %arg1: memref<256x32xf32, #tpu.memory_space<vmem>>, %arg2: memref<32x8xf32, #tpu.memory_space<vmem>>, %arg3: memref<2x256xf32, #tpu.memory_space<vmem>>, %arg4: memref<2x256xi32, #tpu.memory_space<vmem>>, %arg5: memref<256x8xf32, #tpu.memory_space<vmem>>, %arg6: memref<256x8xf32, #tpu.memory_space<vmem>>) attributes {dimension_semantics = [#tpu.dimension_semantics<parallel>], iteration_bounds = array<i64: 1>, scalar_prefetch = 0 : i64, scratch_operands = 0 : i64, tpu.core_type = #tpu.core_type<tc>, window_params = [{transform_indices = @transform_0, window_bounds = array<i64: 256, 32>}, {pipeline_mode = #tpu.pipeline_mode<synchronous>, transform_indices = @transform_1, window_bounds = array<i64: 32, 8>}, {transform_indices = @transform_2, window_bounds = array<i64: 2, 256>}, {transform_indices = @transform_3, window_bounds = array<i64: 2, 256>}, {transform_indices = @transform_4, window_bounds = array<i64: 256, 8>}, {transform_indices = @transform_5, window_bounds = array<i64: 256, 8>}]} {
    %c0 = arith.constant 0 : index
    %c0_0 = arith.constant 0 : index
    %0 = vector.load %arg1[%c0, %c0_0] : memref<256x32xf32, #tpu.memory_space<vmem>>, vector<256x32xf32>
    %c0_1 = arith.constant 0 : index
    %c0_2 = arith.constant 0 : index
    %1 = vector.load %arg2[%c0_1, %c0_2] : memref<32x8xf32, #tpu.memory_space<vmem>>, vector<32x8xf32>
    %cst = arith.constant dense<0.000000e+00> : vector<256x8xf32>
    %2 = tpu.matmul %0, %1, %cst {dimension_numbers = #tpu.dot_dimension_numbers<[1], [0], [0], [1], [0, 0, 1, 1], [], []>} : vector<256x32xf32>, vector<32x8xf32>, vector<256x8xf32> -> vector<256x8xf32>
    %c0_3 = arith.constant 0 : index
    %c0_4 = arith.constant 0 : index
    %3 = vector.load %arg5[%c0_3, %c0_4] : memref<256x8xf32, #tpu.memory_space<vmem>>, vector<256x8xf32>
    tpu.vector_store %arg5[%c0_3, %c0_4], %2 {strides = array<i32>} : memref<256x8xf32, #tpu.memory_space<vmem>>, vector<256x8xf32>,
    %cst_5 = arith.constant dense<0xFF800000> : vector<256xf32>
    %4 = vector.multi_reduction <maximumf>, %2, %cst_5 [1] : vector<256x8xf32> to vector<256xf32>
    %5 = vector.shape_cast %4 : vector<256xf32> to vector<256x1xf32>
    %6 = vector.broadcast %5 : vector<256x1xf32> to vector<256x8xf32>
    %7 = arith.subf %2, %6 : vector<256x8xf32>
    %8 = math.exp %7 : vector<256x8xf32>
    %cst_6 = arith.constant dense<0.000000e+00> : vector<256xf32>
    %9 = vector.multi_reduction <add>, %8, %cst_6 [1] : vector<256x8xf32> to vector<256xf32>
    %10 = vector.shape_cast %9 : vector<256xf32> to vector<256x1xf32>
    %11 = tpu.reciprocal %10 {approx = true} : vector<256x1xf32> -> vector<256x1xf32>
    %12 = vector.broadcast %11 : vector<256x1xf32> to vector<256x8xf32>
    %13 = arith.mulf %8, %12 : vector<256x8xf32>
    %c0_7 = arith.constant 0 : index
    %c0_8 = arith.constant 0 : index
    %14 = vector.load %arg6[%c0_7, %c0_8] : memref<256x8xf32, #tpu.memory_space<vmem>>, vector<256x8xf32>
    tpu.vector_store %arg6[%c0_7, %c0_8], %13 {strides = array<i32>} : memref<256x8xf32, #tpu.memory_space<vmem>>, vector<256x8xf32>,
    %15 = tpu.transpose %13, [1, 0] : vector<256x8xf32> -> vector<8x256xf32>
    %16 = tpu.iota {dimensions = array<i32: 0>} : vector<8x256xi32>
    %17 = arith.sitofp %16 : vector<8x256xi32> to vector<8x256xf32>
    %cst_9 = arith.constant dense<0xFF800000> : vector<256xf32>
    %18 = vector.multi_reduction <maximumf>, %15, %cst_9 [0] : vector<8x256xf32> to vector<256xf32>
    %19 = vector.shape_cast %18 : vector<256xf32> to vector<1x256xf32>
    %20 = vector.broadcast %19 : vector<1x256xf32> to vector<8x256xf32>
    %21 = arith.cmpf oeq, %15, %20 : vector<8x256xf32>
    %cst_10 = arith.constant 8.000000e+00 : f32
    %22 = vector.broadcast %cst_10 : f32 to vector<8x256xf32>
    %23 = arith.select %21, %17, %22 : vector<8x256xi1>, vector<8x256xf32>
    %cst_11 = arith.constant dense<0x7F800000> : vector<256xf32>
    %24 = vector.multi_reduction <minimumf>, %23, %cst_11 [0] : vector<8x256xf32> to vector<256xf32>
    %25 = vector.shape_cast %24 : vector<256xf32> to vector<1x256xf32>
    %26 = vector.broadcast %25 : vector<1x256xf32> to vector<8x256xf32>
    %27 = arith.cmpf oeq, %17, %26 : vector<8x256xf32>
    %cst_12 = arith.constant -1.000000e+00 : f32
    %28 = vector.broadcast %cst_12 : f32 to vector<8x256xf32>
    %29 = arith.select %27, %28, %15 : vector<8x256xi1>, vector<8x256xf32>
    %cst_13 = arith.constant dense<0xFF800000> : vector<256xf32>
    %30 = vector.multi_reduction <maximumf>, %29, %cst_13 [0] : vector<8x256xf32> to vector<256xf32>
    %31 = vector.shape_cast %30 : vector<256xf32> to vector<1x256xf32>
    %32 = vector.broadcast %31 : vector<1x256xf32> to vector<8x256xf32>
    %33 = arith.cmpf oeq, %29, %32 : vector<8x256xf32>
    %cst_14 = arith.constant 8.000000e+00 : f32
    %34 = vector.broadcast %cst_14 : f32 to vector<8x256xf32>
    %35 = arith.select %33, %17, %34 : vector<8x256xi1>, vector<8x256xf32>
    %cst_15 = arith.constant dense<0x7F800000> : vector<256xf32>
    %36 = vector.multi_reduction <minimumf>, %35, %cst_15 [0] : vector<8x256xf32> to vector<256xf32>
    %37 = vector.shape_cast %36 : vector<256xf32> to vector<1x256xf32>
    %38 = tpu.concatenate %19, %31 in 0 : vector<1x256xf32>, vector<1x256xf32> -> vector<2x256xf32>
    %39 = tpu.concatenate %25, %37 in 0 : vector<1x256xf32>, vector<1x256xf32> -> vector<2x256xf32>
    %cst_16 = arith.constant dense<0.000000e+00> : vector<256xf32>
    %40 = vector.multi_reduction <add>, %38, %cst_16 [0] : vector<2x256xf32> to vector<256xf32>
    %41 = vector.shape_cast %40 : vector<256xf32> to vector<1x256xf32>
    %cst_17 = arith.constant 9.99999997E-7 : f32
    %42 = vector.broadcast %cst_17 : f32 to vector<1x256xf32>
    %43 = arith.addf %41, %42 : vector<1x256xf32>
    %44 = tpu.reciprocal %43 {approx = true} : vector<1x256xf32> -> vector<1x256xf32>
    %45 = vector.broadcast %44 : vector<1x256xf32> to vector<2x256xf32>
    %46 = arith.mulf %38, %45 : vector<2x256xf32>
    %c0_18 = arith.constant 0 : index
    %c0_19 = arith.constant 0 : index
    %47 = vector.load %arg3[%c0_18, %c0_19] : memref<2x256xf32, #tpu.memory_space<vmem>>, vector<2x256xf32>
    tpu.vector_store %arg3[%c0_18, %c0_19], %46 {strides = array<i32>} : memref<2x256xf32, #tpu.memory_space<vmem>>, vector<2x256xf32>,
    %48 = arith.fptosi %39 : vector<2x256xf32> to vector<2x256xi32>
    %c0_20 = arith.constant 0 : index
    %c0_21 = arith.constant 0 : index
    %49 = vector.load %arg4[%c0_20, %c0_21] : memref<2x256xi32, #tpu.memory_space<vmem>>, vector<2x256xi32>
    tpu.vector_store %arg4[%c0_20, %c0_21], %48 {strides = array<i32>} : memref<2x256xi32, #tpu.memory_space<vmem>>, vector<2x256xi32>,
    return
  }
  func.func @transform_0(%arg0: i32) -> (i32, i32) {
    %c0_i32 = arith.constant 0 : i32
    %c0_i32_0 = arith.constant 0 : i32
    return %arg0, %c0_i32 : i32, i32
  }
  func.func @transform_1(%arg0: i32) -> (i32, i32) {
    %c0_i32 = arith.constant 0 : i32
    %c0_i32_0 = arith.constant 0 : i32
    %c0_i32_1 = arith.constant 0 : i32
    return %c0_i32, %c0_i32_0 : i32, i32
  }
  func.func @transform_2(%arg0: i32) -> (i32, i32) {
    %c0_i32 = arith.constant 0 : i32
    %c0_i32_0 = arith.constant 0 : i32
    return %c0_i32, %arg0 : i32, i32
  }
  func.func @transform_3(%arg0: i32) -> (i32, i32) {
    %c0_i32 = arith.constant 0 : i32
    %c0_i32_0 = arith.constant 0 : i32
    return %c0_i32, %arg0 : i32, i32
  }
  func.func @transform_4(%arg0: i32) -> (i32, i32) {
    %c0_i32 = arith.constant 0 : i32
    %c0_i32_0 = arith.constant 0 : i32
    return %arg0, %c0_i32 : i32, i32
  }
  func.func @transform_5(%arg0: i32) -> (i32, i32) {
    %c0_i32 = arith.constant 0 : i32
    %c0_i32_0 = arith.constant 0 : i32
    return %arg0, %c0_i32 : i32, i32
  }
}

</mosaic_0001>

<bundles_post_ra>
// kernel: tpu_custom_call.1
= control target key start
LH: loop header
LB: loop body
LE: loop exit
PB: predicated region body
PF: predicated region fallthrough
CT: control target
= control target key end

     0   :  { %11 = vsyncpa [#allocation3], 0  ;;  %vm53_vm0 = vcmask 261120   ;;  %s1957_s0 = inlined_call_operand.vmem [shape: f32[256,32], index: 0, kind: input, shape index: {}]   ;;  %s1958_s1 = inlined_call_operand.vmem [shape: f32[32,8], index: 1, kind: input, shape index: {}]   ;;  %s1959_s2 = inlined_call_operand.hbm [shape: f32[2,256], index: 2, kind: output, shape index: {0}]   ;;  %s1960_s3 = inlined_call_operand.hbm [shape: s32[2,256], index: 3, kind: output, shape index: {1}]   ;;  %s1961_s4 = inlined_call_operand.vmem [shape: f32[256,8], index: 4, kind: output, shape index: {2}]   ;;  %s1962_s5 = inlined_call_operand.vmem [shape: f32[256,8], index: 5, kind: output, shape index: {3}]  }
   0x1   :  { %v52_v0 = vld [vmem:[%s1958_s1 + $0x18] sm:$0xff]  ;;  %v51_v1 = vld [vmem:[%s1958_s1 + $0x10] sm:$0xff]  ;;  %v50_v2 = vld [vmem:[%s1958_s1 + $0x8] sm:$0xff] }
   0x2   :  { %162 = vmatpush.msra.mxu0 %v52_v0  ;;  %916 = vmatpush.msra.mxu1 %v52_v0  ;;  %v49_v3 = vld [vmem:[%s1958_s1] sm:$0xff] }
   0x3   :  { %917 = vmatpush.msra.mxu2 %v52_v0  ;;  %918 = vmatpush.msra.mxu3 %v52_v0  ;;  %v17_v4 = vld [vmem:[%s1957_s0] sm:$0xff] }
   0x4   :  { %163 = vmatpush.msra.mxu0 %v51_v1  ;;  %919 = vmatpush.msra.mxu1 %v51_v1  ;;  %v25_v5 = vld [vmem:[%s1957_s0 + $0x40] sm:$0xff] }
   0x5   :  { %920 = vmatpush.msra.mxu2 %v51_v1  ;;  %921 = vmatpush.msra.mxu3 %v51_v1  ;;  %v33_v6 = vld [vmem:[%s1957_s0 + $0x80] sm:$0xff] }
   0x6   :  { %164 = vmatpush.msra.mxu0 %v50_v2  ;;  %922 = vmatpush.msra.mxu1 %v50_v2  ;;  %v41_v7 = vld [vmem:[%s1957_s0 + $0xc0] sm:$0xff] }
   0x7   :  { %923 = vmatpush.msra.mxu2 %v50_v2  ;;  %924 = vmatpush.msra.mxu3 %v50_v2 }
   0x8   :  { %165 = vmatpush.msra.mxu0 %v49_v3  ;;  %925 = vmatpush.msra.mxu1 %v49_v3 }
   0x9   :  { %12 = vsyncpa [#allocation5], 0  ;;  %926 = vmatpush.msra.mxu2 %v49_v3  ;;  %927 = vmatpush.msra.mxu3 %v49_v3  ;;  %v18_v8 = vld [vmem:[%s1957_s0 + $0x8] sm:$0xff]  ;;  %v19_v12 = vld [vmem:[%s1957_s0 + $0x10] sm:$0xff]  ;;  %vm263_vm1 = vcmask 64512   ;;  %vm807_vm6 = vcmask 1040384  }
   0xa   :  { %884 = vmatmul.msk.f32.vlgmr.msra.gmra.mxu0 %vm53_vm0, %v17_v4  ;;  %892 = vmatmul.msk.f32.vlgmr.msra.gmra.mxu1 %vm53_vm0, %v25_v5  ;;  %v26_v9 = vld [vmem:[%s1957_s0 + $0x48] sm:$0xff]  ;;  %v27_v13 = vld [vmem:[%s1957_s0 + $0x50] sm:$0xff]  ;;  %v20_v16 = vld [vmem:[%s1957_s0 + $0x18] sm:$0xff]  ;;  %vm812_vm7 = vcmask 1041408   ;;  %s862_s6 = sshll.u32 %s1960_s3, 4  ;;  %s1125_s1 = smov [#allocation2]   ;;  %s863_s6 = int_to_ptr.hbm [resolvable:$true] %s862_s6 }
   0xb   :  { %900 = vmatmul.msk.f32.vlgmr.msra.gmra.mxu2 %vm53_vm0, %v33_v6  ;;  %908 = vmatmul.msk.f32.vlgmr.msra.gmra.mxu3 %vm53_vm0, %v41_v7  ;;  %v34_v10 = vld [vmem:[%s1957_s0 + $0x88] sm:$0xff]  ;;  %v43_v14 = vld [vmem:[%s1957_s0 + $0xd0] sm:$0xff]  ;;  %v28_v17 = vld [vmem:[%s1957_s0 + $0x58] sm:$0xff]  ;;  %s849_s7 = sshll.u32 %s1125_s1, 4  ;;  %s851_s10 = sshll.u32 %s1959_s2, 4  ;;  %s850_s7 = int_to_ptr.vmem [resolvable:$true] %s849_s7  ;;  %s852_s10 = int_to_ptr.hbm [resolvable:$true] %s851_s10 }
   0xc   :  { %v42_v11 = vld [vmem:[%s1957_s0 + $0xc8] sm:$0xff]  ;;  %v35_v15 = vld [vmem:[%s1957_s0 + $0x90] sm:$0xff]  ;;  %v36_v18 = vld [vmem:[%s1957_s0 + $0x98] sm:$0xff] }
   0xd   :  { %v44_v19 = vld [vmem:[%s1957_s0 + $0xd8] sm:$0xff]  ;;  %v21_v20 = vld [vmem:[%s1957_s0 + $0x20] sm:$0xff]  ;;  %v22_v24 = vld [vmem:[%s1957_s0 + $0x28] sm:$0xff] }
   0xe   :  { %v29_v21 = vld [vmem:[%s1957_s0 + $0x60] sm:$0xff]  ;;  %v30_v25 = vld [vmem:[%s1957_s0 + $0x68] sm:$0xff]  ;;  %v23_v28 = vld [vmem:[%s1957_s0 + $0x30] sm:$0xff] }
   0xf   :  { %v37_v22 = vld [vmem:[%s1957_s0 + $0xa0] sm:$0xff]  ;;  %v38_v26 = vld [vmem:[%s1957_s0 + $0xa8] sm:$0xff]  ;;  %v31_v29 = vld [vmem:[%s1957_s0 + $0x70] sm:$0xff] }
  0x10   :  { %v45_v23 = vld [vmem:[%s1957_s0 + $0xe0] sm:$0xff]  ;;  %v46_v27 = vld [vmem:[%s1957_s0 + $0xe8] sm:$0xff]  ;;  %v39_v30 = vld [vmem:[%s1957_s0 + $0xb0] sm:$0xff] }
  0x11   :  { %v47_v31 = vld [vmem:[%s1957_s0 + $0xf0] sm:$0xff]  ;;  %v24_v32 = vld [vmem:[%s1957_s0 + $0x38] sm:$0xff] }
  0x12   :  { %885 = vmatmul.msk.f32.gmra.mxu0 %vm53_vm0, %v18_v8  ;;  %893 = vmatmul.msk.f32.gmra.mxu1 %vm53_vm0, %v26_v9  ;;  %v32_v33 = vld [vmem:[%s1957_s0 + $0x78] sm:$0xff] }
  0x13   :  { %901 = vmatmul.msk.f32.gmra.mxu2 %vm53_vm0, %v34_v10  ;;  %909 = vmatmul.msk.f32.gmra.mxu3 %vm53_vm0, %v42_v11  ;;  %v40_v34 = vld [vmem:[%s1957_s0 + $0xb8] sm:$0xff] }
  0x14   :  { %v48_v35 = vld [vmem:[%s1957_s0 + $0xf8] sm:$0xff] }
  0x1a   :  { %886 = vmatmul.msk.f32.gmra.mxu0 %vm53_vm0, %v19_v12  ;;  %894 = vmatmul.msk.f32.gmra.mxu1 %vm53_vm0, %v27_v13 }
  0x1b   :  { %910 = vmatmul.msk.f32.gmra.mxu3 %vm53_vm0, %v43_v14  ;;  %902 = vmatmul.msk.f32.gmra.mxu2 %vm53_vm0, %v35_v15 }
  0x22   :  { %887 = vmatmul.msk.f32.gmra.mxu0 %vm53_vm0, %v20_v16  ;;  %895 = vmatmul.msk.f32.gmra.mxu1 %vm53_vm0, %v28_v17 }
  0x23   :  { %903 = vmatmul.msk.f32.gmra.mxu2 %vm53_vm0, %v36_v18  ;;  %911 = vmatmul.msk.f32.gmra.mxu3 %vm53_vm0, %v44_v19 }
  0x2a   :  { %888 = vmatmul.msk.f32.gmra.mxu0 %vm53_vm0, %v21_v20  ;;  %896 = vmatmul.msk.f32.gmra.mxu1 %vm53_vm0, %v29_v21 }
  0x2b   :  { %904 = vmatmul.msk.f32.gmra.mxu2 %vm53_vm0, %v37_v22  ;;  %912 = vmatmul.msk.f32.gmra.mxu3 %vm53_vm0, %v45_v23 }
  0x32   :  { %889 = vmatmul.msk.f32.gmra.mxu0 %vm53_vm0, %v22_v24  ;;  %897 = vmatmul.msk.f32.gmra.mxu1 %vm53_vm0, %v30_v25 }
  0x33   :  { %905 = vmatmul.msk.f32.gmra.mxu2 %vm53_vm0, %v38_v26  ;;  %913 = vmatmul.msk.f32.gmra.mxu3 %vm53_vm0, %v46_v27 }
  0x3a   :  { %890 = vmatmul.msk.f32.gmra.mxu0 %vm53_vm0, %v23_v28  ;;  %898 = vmatmul.msk.f32.gmra.mxu1 %vm53_vm0, %v31_v29 }
  0x3b   :  { %906 = vmatmul.msk.f32.gmra.mxu2 %vm53_vm0, %v39_v30  ;;  %914 = vmatmul.msk.f32.gmra.mxu3 %vm53_vm0, %v47_v31 }
  0x42   :  { %891 = vmatmul.msk.f32.gmra.mxu0 %vm53_vm0, %v24_v32  ;;  %899 = vmatmul.msk.f32.gmra.mxu1 %vm53_vm0, %v32_v33 }
  0x43   :  { %907 = vmatmul.msk.f32.gmra.mxu2 %vm53_vm0, %v40_v34  ;;  %915 = vmatmul.msk.f32.gmra.mxu3 %vm53_vm0, %v48_v35 }
  0x87   :  { %v1296_v36 = vpop.f32.mrf.mxu0  ;;  %v1298_v37 = vpop.f32.mrf.mxu1 }
  0x88   :  { %264 = vst.msk [vmem:[%s1961_s4] sm:$0xff] %vm263_vm1, %v1296_v36  ;;  %v320_v38 = vsel %vm263_vm1, %v1298_v37, -inf  ;;  %v296_v39 = vsel %vm263_vm1, %v1296_v36, -inf }
  0x89   :  { %272 = vst.msk [vmem:[%s1961_s4 + $0x40] sm:$0xff] %vm263_vm1, %v1298_v37  ;;  %321 = vmax.xlane.f32.xlu2 %v320_v38  ;;  %297 = vmax.xlane.f32.xlu0 %v296_v39 }
  0x8e   :  { %v1314_v40 = vpop.f32.mrf.mxu2  ;;  %v1316_v41 = vpop.f32.mrf.mxu3 }
  0x8f   :  { %280 = vst.msk [vmem:[%s1961_s4 + $0x80] sm:$0xff] %vm263_vm1, %v1314_v40  ;;  %v344_v42 = vsel %vm263_vm1, %v1314_v40, -inf  ;;  %v1325_v43 = vpop.f32.mrf.mxu0  ;;  %v1327_v44 = vpop.f32.mrf.mxu1  ;;  %v368_v45 = vsel %vm263_vm1, %v1316_v41, -inf }
  0x90   :  { %288 = vst.msk [vmem:[%s1961_s4 + $0xc0] sm:$0xff] %vm263_vm1, %v1316_v41  ;;  %345 = vmax.xlane.f32.xlu1 %v344_v42  ;;  %v299_v52 = vsel %vm263_vm1, %v1325_v43, -inf  ;;  %v323_v59 = vsel %vm263_vm1, %v1327_v44, -inf }
  0x91   :  { %369 = vmax.xlane.f32.xlu0 %v368_v45  ;;  %265 = vst.msk [vmem:[%s1961_s4 + $0x8] sm:$0xff] %vm263_vm1, %v1325_v43 }
  0x92   :  { %273 = vst.msk [vmem:[%s1961_s4 + $0x48] sm:$0xff] %vm263_vm1, %v1327_v44 }
  0x96   :  { %v1346_v46 = vpop.f32.mrf.mxu2  ;;  %v1348_v47 = vpop.f32.mrf.mxu3 }
  0x97   :  { %281 = vst.msk [vmem:[%s1961_s4 + $0x88] sm:$0xff] %vm263_vm1, %v1346_v46  ;;  %v371_v48 = vsel %vm263_vm1, %v1348_v47, -inf  ;;  %v347_v49 = vsel %vm263_vm1, %v1346_v46, -inf  ;;  %v1359_v50 = vpop.f32.mrf.mxu0  ;;  %v1361_v51 = vpop.f32.mrf.mxu1 }
  0x98   :  { %289 = vst.msk [vmem:[%s1961_s4 + $0xc8] sm:$0xff] %vm263_vm1, %v1348_v47  ;;  %372 = vmax.xlane.f32.xlu1 %v371_v48  ;;  %348 = vmax.xlane.f32.xlu2 %v347_v49  ;;  %v302_v53 = vsel %vm263_vm1, %v1359_v50, -inf  ;;  %v326_v61 = vsel %vm263_vm1, %v1361_v51, -inf }
  0x99   :  { %300 = vmax.xlane.f32.xlu0 %v299_v52  ;;  %266 = vst.msk [vmem:[%s1961_s4 + $0x10] sm:$0xff] %vm263_vm1, %v1359_v50 }
  0x9a   :  { %274 = vst.msk [vmem:[%s1961_s4 + $0x50] sm:$0xff] %vm263_vm1, %v1361_v51 }
  0x9e   :  { %v1382_v54 = vpop.f32.mrf.mxu3  ;;  %v1384_v55 = vpop.f32.mrf.mxu2 }
  0x9f   :  { %290 = vst.msk [vmem:[%s1961_s4 + $0xd0] sm:$0xff] %vm263_vm1, %v1382_v54  ;;  %v374_v56 = vsel %vm263_vm1, %v1382_v54, -inf  ;;  %v1393_v57 = vpop.f32.mrf.mxu0  ;;  %v1395_v58 = vpop.f32.mrf.mxu1  ;;  %v350_v62 = vsel %vm263_vm1, %v1384_v55, -inf }
  0xa0   :  { %375 = vmax.xlane.f32.xlu2 %v374_v56  ;;  %303 = vmax.xlane.f32.xlu1 %v302_v53  ;;  %267 = vst.msk [vmem:[%s1961_s4 + $0x18] sm:$0xff] %vm263_vm1, %v1393_v57  ;;  %v329_v60 = vsel %vm263_vm1, %v1395_v58, -inf  ;;  %v305_v3 = vsel %vm263_vm1, %v1393_v57, -inf }
  0xa1   :  { %324 = vmax.xlane.f32.xlu0 %v323_v59  ;;  %275 = vst.msk [vmem:[%s1961_s4 + $0x58] sm:$0xff] %vm263_vm1, %v1395_v58 }
  0xa2   :  { %282 = vst.msk [vmem:[%s1961_s4 + $0x90] sm:$0xff] %vm263_vm1, %v1384_v55 }
  0xa6   :  { %v1420_v63 = vpop.f32.mrf.mxu2  ;;  %v1422_v0 = vpop.f32.mrf.mxu3 }
  0xa7   :  { %v1424_v1 = vpop.f32.mrf.mxu0  ;;  %283 = vst.msk [vmem:[%s1961_s4 + $0x98] sm:$0xff] %vm263_vm1, %v1420_v63  ;;  %v1431_v2 = vpop.f32.mrf.mxu1  ;;  %v377_v5 = vsel %vm263_vm1, %v1422_v0, -inf  ;;  %v353_v10 = vsel %vm263_vm1, %v1420_v63, -inf }
  0xa8   :  { %330 = vmax.xlane.f32.xlu2 %v329_v60  ;;  %327 = vmax.xlane.f32.xlu1 %v326_v61  ;;  %268 = vst.msk [vmem:[%s1961_s4 + $0x20] sm:$0xff] %vm263_vm1, %v1424_v1  ;;  %v308_v4 = vsel %vm263_vm1, %v1424_v1, -inf  ;;  %v332_v12 = vsel %vm263_vm1, %v1431_v2, -inf }
  0xa9   :  { %351 = vmax.xlane.f32.xlu0 %v350_v62  ;;  %291 = vst.msk [vmem:[%s1961_s4 + $0xd8] sm:$0xff] %vm263_vm1, %v1422_v0 }
  0xaa   :  { %276 = vst.msk [vmem:[%s1961_s4 + $0x60] sm:$0xff] %vm263_vm1, %v1431_v2 }
  0xae   :  { %v1454_v6 = vpop.f32.mrf.mxu2  ;;  %v1456_v7 = vpop.f32.mrf.mxu3 }
  0xaf   :  { %284 = vst.msk [vmem:[%s1961_s4 + $0xa0] sm:$0xff] %vm263_vm1, %v1454_v6  ;;  %v1463_v8 = vpop.f32.mrf.mxu0  ;;  %v1465_v9 = vpop.f32.mrf.mxu1  ;;  %v356_v11 = vsel %vm263_vm1, %v1454_v6, -inf  ;;  %v380_v17 = vsel %vm263_vm1, %v1456_v7, -inf }
  0xb0   :  { %306 = vmax.xlane.f32.xlu1 %v305_v3  ;;  %309 = vmax.xlane.f32.xlu2 %v308_v4  ;;  %269 = vst.msk [vmem:[%s1961_s4 + $0x28] sm:$0xff] %vm263_vm1, %v1463_v8  ;;  %v311_v18 = vsel %vm263_vm1, %v1463_v8, -inf  ;;  %v335_v24 = vsel %vm263_vm1, %v1465_v9, -inf }
  0xb1   :  { %378 = vmax.xlane.f32.xlu0 %v377_v5  ;;  %292 = vst.msk [vmem:[%s1961_s4 + $0xe0] sm:$0xff] %vm263_vm1, %v1456_v7 }
  0xb2   :  { %277 = vst.msk [vmem:[%s1961_s4 + $0x68] sm:$0xff] %vm263_vm1, %v1465_v9 }
  0xb6   :  { %v1488_v13 = vpop.f32.mrf.mxu2  ;;  %v1495_v14 = vpop.f32.mrf.mxu3 }
  0xb7   :  { %285 = vst.msk [vmem:[%s1961_s4 + $0xa8] sm:$0xff] %vm263_vm1, %v1488_v13  ;;  %v1497_v15 = vpop.f32.mrf.mxu0  ;;  %v1509_v16 = vpop.f32.mrf.mxu1  ;;  %v359_v19 = vsel %vm263_vm1, %v1488_v13, -inf  ;;  %v383_v25 = vsel %vm263_vm1, %v1495_v14, -inf }
  0xb8   :  { %354 = vmax.xlane.f32.xlu1 %v353_v10  ;;  %357 = vmax.xlane.f32.xlu2 %v356_v11  ;;  %293 = vst.msk [vmem:[%s1961_s4 + $0xe8] sm:$0xff] %vm263_vm1, %v1495_v14  ;;  %v314_v26 = vsel %vm263_vm1, %v1497_v15, -inf  ;;  %v338_v30 = vsel %vm263_vm1, %v1509_v16, -inf }
  0xb9   :  { %333 = vmax.xlane.f32.xlu0 %v332_v12  ;;  %270 = vst.msk [vmem:[%s1961_s4 + $0x30] sm:$0xff] %vm263_vm1, %v1497_v15 }
  0xba   :  { %278 = vst.msk [vmem:[%s1961_s4 + $0x70] sm:$0xff] %vm263_vm1, %v1509_v16 }
  0xbe   :  { %v1522_v20 = vpop.f32.mrf.mxu2  ;;  %v1529_v21 = vpop.f32.mrf.mxu3 }
  0xbf   :  { %286 = vst.msk [vmem:[%s1961_s4 + $0xb0] sm:$0xff] %vm263_vm1, %v1522_v20  ;;  %v1531_v22 = vpop.f32.mrf.mxu0  ;;  %v1543_v23 = vpop.f32.mrf.mxu1  ;;  %v362_v29 = vsel %vm263_vm1, %v1522_v20, -inf  ;;  %v386_v31 = vsel %vm263_vm1, %v1529_v21, -inf }
  0xc0   :  { %381 = vmax.xlane.f32.xlu1 %v380_v17  ;;  %312 = vmax.xlane.f32.xlu2 %v311_v18  ;;  %294 = vst.msk [vmem:[%s1961_s4 + $0xf0] sm:$0xff] %vm263_vm1, %v1529_v21  ;;  %v317_v33 = vsel %vm263_vm1, %v1531_v22, -inf  ;;  %v341_v34 = vsel %vm263_vm1, %v1543_v23, -inf }
  0xc1   :  { %360 = vmax.xlane.f32.xlu0 %v359_v19  ;;  %271 = vst.msk [vmem:[%s1961_s4 + $0x38] sm:$0xff] %vm263_vm1, %v1531_v22 }
  0xc2   :  { %279 = vst.msk [vmem:[%s1961_s4 + $0x78] sm:$0xff] %vm263_vm1, %v1543_v23 }
  0xc6   :  { %v1556_v27 = vpop.f32.mrf.mxu2  ;;  %v1563_v28 = vpop.f32.mrf.mxu3 }
  0xc7   :  { %287 = vst.msk [vmem:[%s1961_s4 + $0xb8] sm:$0xff] %vm263_vm1, %v1556_v27  ;;  %v365_v32 = vsel %vm263_vm1, %v1556_v27, -inf  ;;  %v389_v35 = vsel %vm263_vm1, %v1563_v28, -inf }
  0xc8   :  { %336 = vmax.xlane.f32.xlu1 %v335_v24  ;;  %384 = vmax.xlane.f32.xlu2 %v383_v25  ;;  %295 = vst.msk [vmem:[%s1961_s4 + $0xf8] sm:$0xff] %vm263_vm1, %v1563_v28 }
  0xc9   :  { %315 = vmax.xlane.f32.xlu0 %v314_v26 }
  0xd0   :  { %363 = vmax.xlane.f32.xlu1 %v362_v29  ;;  %339 = vmax.xlane.f32.xlu2 %v338_v30 }
  0xd1   :  { %387 = vmax.xlane.f32.xlu0 %v386_v31 }
  0xd8   :  { %366 = vmax.xlane.f32.xlu2 %v365_v32  ;;  %318 = vmax.xlane.f32.xlu1 %v317_v33 }
  0xd9   :  { %342 = vmax.xlane.f32.xlu0 %v341_v34 }
  0xe0   :  { %390 = vmax.xlane.f32.xlu1 %v389_v35 }
  0xfc   :  { %v322_v38 = vpop.xlane.xlu2 %321  ;;  %v298_v39 = vpop.xlane.xlu0 %297 }
  0xfd   :  { %v400_v42 = vsub.f32 %v1298_v37, %v322_v38  ;;  %v392_v45 = vsub.f32 %v1296_v36, %v298_v39 }
  0xff   :  { %v440_v48 = vmul.f32 1.442695, %v400_v42  ;;  %v424_v49 = vmul.f32 1.442695, %v392_v45 }
 0x101   :  { %940 = vpow2.f32 %v440_v48 }
 0x102   :  { %942 = vpow2.f32 %v424_v49 }
 0x103   :  { %v346_v52 = vpop.xlane.xlu1 %345 }
 0x104   :  { %v408_v53 = vsub.f32 %v1314_v40, %v346_v52  ;;  %v370_v56 = vpop.xlane.xlu0 %369 }
 0x105   :  { %v416_v59 = vsub.f32 %v1316_v41, %v370_v56 }
 0x106   :  { %v456_v60 = vmul.f32 1.442695, %v408_v53 }
 0x107   :  { %v1588_v61 = vpop.eup %940  ;;  %v472_v62 = vmul.f32 1.442695, %v416_v59 }
 0x108   :  { %v1590_v3 = vpop.eup %942  ;;  %944 = vpow2.f32 %v456_v60  ;;  %v512_v36 = vsel %vm263_vm1, %v1588_v61, 0.0 }
 0x109   :  { %946 = vpow2.f32 %v472_v62  ;;  %v488_v37 = vsel %vm263_vm1, %v1590_v3, 0.0  ;;  %513 = vadd.xlane.f32.xlu1 %v512_v36 }
 0x10a   :  { %489 = vadd.xlane.f32.xlu2 %v488_v37 }
 0x10b   :  { %v373_v40 = vpop.xlane.xlu1 %372  ;;  %v349_v4 = vpop.xlane.xlu2 %348 }
 0x10c   :  { %v409_v41 = vsub.f32 %v1346_v46, %v349_v4  ;;  %v301_v5 = vpop.xlane.xlu0 %300  ;;  %v417_v18 = vsub.f32 %v1348_v47, %v373_v40 }
 0x10d   :  { %v393_v10 = vsub.f32 %v1325_v43, %v301_v5 }
 0x10e   :  { %v1598_v11 = vpop.eup %944  ;;  %v458_v12 = vmul.f32 1.442695, %v409_v41  ;;  %v474_v46 = vmul.f32 1.442695, %v417_v18 }
 0x10f   :  { %v1600_v17 = vpop.eup %946  ;;  %v426_v19 = vmul.f32 1.442695, %v393_v10  ;;  %v536_v25 = vsel %vm263_vm1, %v1598_v11, 0.0 }
 0x110   :  { %v560_v24 = vsel %vm263_vm1, %v1600_v17, 0.0  ;;  %948 = vpow2.f32 %v458_v12 }
 0x111   :  { %561 = vadd.xlane.f32.xlu0 %v560_v24  ;;  %537 = vadd.xlane.f32.xlu1 %v536_v25  ;;  %950 = vpow2.f32 %v426_v19 }
 0x112   :  { %952 = vpow2.f32 %v474_v46 }
 0x113   :  { %v376_v43 = vpop.xlane.xlu2 %375  ;;  %v304_v26 = vpop.xlane.xlu1 %303 }
 0x114   :  { %v394_v29 = vsub.f32 %v1359_v50, %v304_v26  ;;  %v325_v30 = vpop.xlane.xlu0 %324  ;;  %v418_v33 = vsub.f32 %v1382_v54, %v376_v43 }
 0x115   :  { %v401_v31 = vsub.f32 %v1327_v44, %v325_v30 }
 0x116   :  { %v428_v47 = vmul.f32 1.442695, %v394_v29  ;;  %v1609_v32 = vpop.eup %948  ;;  %v476_v44 = vmul.f32 1.442695, %v418_v33 }
 0x117   :  { %v442_v34 = vmul.f32 1.442695, %v401_v31  ;;  %v1612_v35 = vpop.eup %950  ;;  %v539_v38 = vsel %vm263_vm1, %v1609_v32, 0.0 }
 0x118   :  { %954 = vpow2.f32 %v428_v47  ;;  %540 = vadd.xlane.f32.xlu2 %v539_v38  ;;  %v491_v50 = vsel %vm263_vm1, %v1612_v35, 0.0  ;;  %v1619_v54 = vpop.eup %952 }
 0x119   :  { %956 = vpow2.f32 %v442_v34  ;;  %492 = vadd.xlane.f32.xlu0 %v491_v50  ;;  %v563_v62 = vsel %vm263_vm1, %v1619_v54, 0.0 }
 0x11a   :  { %958 = vpow2.f32 %v476_v44 }
 0x11b   :  { %v331_v39 = vpop.xlane.xlu2 %330  ;;  %v328_v42 = vpop.xlane.xlu1 %327 }
 0x11c   :  { %v402_v45 = vsub.f32 %v1361_v51, %v328_v42  ;;  %v352_v48 = vpop.xlane.xlu0 %351  ;;  %v403_v56 = vsub.f32 %v1395_v58, %v331_v39 }
 0x11d   :  { %v410_v49 = vsub.f32 %v1384_v55, %v352_v48 }
 0x11e   :  { %v444_v52 = vmul.f32 1.442695, %v402_v45  ;;  %v1622_v53 = vpop.eup %954  ;;  %v446_v36 = vmul.f32 1.442695, %v403_v56 }
 0x11f   :  { %v460_v59 = vmul.f32 1.442695, %v410_v49  ;;  %v1625_v60 = vpop.eup %956  ;;  %v494_v51 = vsel %vm263_vm1, %v1622_v53, 0.0 }
 0x120   :  { %960 = vpow2.f32 %v444_v52  ;;  %564 = vadd.xlane.f32.xlu2 %v563_v62  ;;  %495 = vadd.xlane.f32.xlu1 %v494_v51  ;;  %v515_v55 = vsel %vm263_vm1, %v1625_v60, 0.0  ;;  %v1634_v41 = vpop.eup %958 }
 0x121   :  { %962 = vpow2.f32 %v460_v59  ;;  %516 = vadd.xlane.f32.xlu0 %v515_v55 }
 0x122   :  { %964 = vpow2.f32 %v446_v36 }
 0x123   :  { %v307_v37 = vpop.xlane.xlu1 %306  ;;  %v310_v58 = vpop.xlane.xlu2 %309 }
 0x124   :  { %v395_v40 = vsub.f32 %v1393_v57, %v307_v37  ;;  %v379_v4 = vpop.xlane.xlu0 %378  ;;  %v396_v18 = vsub.f32 %v1424_v1, %v310_v58  ;;  %v566_v57 = vsel %vm263_vm1, %v1634_v41, 0.0 }
 0x125   :  { %v419_v5 = vsub.f32 %v1422_v0, %v379_v4 }
 0x126   :  { %v430_v10 = vmul.f32 1.442695, %v395_v40  ;;  %v1637_v12 = vpop.eup %960  ;;  %v432_v46 = vmul.f32 1.442695, %v396_v18 }
 0x127   :  { %v478_v19 = vmul.f32 1.442695, %v419_v5  ;;  %v1640_v24 = vpop.eup %962  ;;  %v518_v25 = vsel %vm263_vm1, %v1637_v12, 0.0 }
 0x128   :  { %966 = vpow2.f32 %v430_v10  ;;  %519 = vadd.xlane.f32.xlu2 %v518_v25  ;;  %567 = vadd.xlane.f32.xlu1 %v566_v57  ;;  %v542_v0 = vsel %vm263_vm1, %v1640_v24, 0.0  ;;  %v1652_v31 = vpop.eup %964 }
 0x129   :  { %968 = vpow2.f32 %v478_v19  ;;  %543 = vadd.xlane.f32.xlu0 %v542_v0 }
 0x12a   :  { %970 = vpow2.f32 %v432_v46 }
 0x12b   :  { %v355_v43 = vpop.xlane.xlu1 %354  ;;  %v358_v1 = vpop.xlane.xlu2 %357 }
 0x12c   :  { %v411_v26 = vsub.f32 %v1420_v63, %v355_v43  ;;  %v412_v29 = vsub.f32 %v1454_v6, %v358_v1  ;;  %v1650_v30 = vpop.xlane.xlu0 %333  ;;  %v521_v63 = vsel %vm263_vm1, %v1652_v31, 0.0 }
 0x12e   :  { %v1654_v47 = vpop.eup %966  ;;  %v462_v33 = vmul.f32 1.442695, %v411_v26  ;;  %v464_v34 = vmul.f32 1.442695, %v412_v29 }
 0x12f   :  { %v497_v38 = vsel %vm263_vm1, %v1654_v47, 0.0  ;;  %v1658_v50 = vpop.eup %968 }
 0x130   :  { %972 = vpow2.f32 %v462_v33  ;;  %498 = vadd.xlane.f32.xlu2 %v497_v38  ;;  %522 = vadd.xlane.f32.xlu1 %v521_v63  ;;  %v569_v6 = vsel %vm263_vm1, %v1658_v50, 0.0  ;;  %v1666_v49 = vpop.eup %970 }
 0x131   :  { %974 = vpow2.f32 %v464_v34  ;;  %570 = vadd.xlane.f32.xlu0 %v569_v6 }
 0x133   :  { %v382_v44 = vpop.xlane.xlu1 %381  ;;  %v313_v39 = vpop.xlane.xlu2 %312 }
 0x134   :  { %v420_v42 = vsub.f32 %v1456_v7, %v382_v44  ;;  %v397_v45 = vsub.f32 %v1463_v8, %v313_v39  ;;  %v361_v48 = vpop.xlane.xlu0 %360  ;;  %v500_v8 = vsel %vm263_vm1, %v1666_v49, 0.0 }
 0x135   :  { %v413_v52 = vsub.f32 %v1488_v13, %v361_v48  ;;  %v404_v48 = vsub.f32 %v1431_v2, %v1650_v30 }
 0x136   :  { %v1669_v56 = vpop.eup %972  ;;  %v480_v59 = vmul.f32 1.442695, %v420_v42  ;;  %v434_v62 = vmul.f32 1.442695, %v397_v45 }
 0x137   :  { %v1671_v51 = vpop.eup %974  ;;  %v466_v55 = vmul.f32 1.442695, %v413_v52  ;;  %v545_v36 = vsel %vm263_vm1, %v1669_v56, 0.0 }
 0x138   :  { %976 = vpow2.f32 %v480_v59  ;;  %v548_v7 = vsel %vm263_vm1, %v1671_v51, 0.0  ;;  %546 = vadd.xlane.f32.xlu1 %v545_v36 }
 0x139   :  { %978 = vpow2.f32 %v434_v62  ;;  %549 = vadd.xlane.f32.xlu2 %v548_v7  ;;  %501 = vadd.xlane.f32.xlu0 %v500_v8  ;;  %v448_v62 = vmul.f32 1.442695, %v404_v48 }
 0x13a   :  { %980 = vpow2.f32 %v466_v55 }
 0x13b   :  { %v337_v13 = vpop.xlane.xlu1 %336  ;;  %v385_v37 = vpop.xlane.xlu2 %384 }
 0x13c   :  { %v316_v58 = vpop.xlane.xlu0 %315  ;;  %v405_v10 = vsub.f32 %v1465_v9, %v337_v13  ;;  %v421_v1 = vsub.f32 %v1495_v14, %v385_v37 }
 0x13d   :  { %v398_v40 = vsub.f32 %v1497_v15, %v316_v58 }
 0x13e   :  { %v1680_v4 = vpop.eup %976  ;;  %v450_v0 = vmul.f32 1.442695, %v405_v10  ;;  %v482_v34 = vmul.f32 1.442695, %v421_v1 }
 0x13f   :  { %v1682_v5 = vpop.eup %978  ;;  %v436_v18 = vmul.f32 1.442695, %v398_v40  ;;  %v572_v19 = vsel %vm263_vm1, %v1680_v4, 0.0 }
 0x140   :  { %v1687_v25 = vpop.eup %980  ;;  %v503_v57 = vsel %vm263_vm1, %v1682_v5, 0.0 }
 0x141   :  { %573 = vadd.xlane.f32.xlu2 %v572_v19  ;;  %504 = vadd.xlane.f32.xlu1 %v503_v57  ;;  %v551_v15 = vsel %vm263_vm1, %v1687_v25, 0.0  ;;  %982 = vpow2.f32 %v436_v18 }
 0x142   :  { %552 = vadd.xlane.f32.xlu0 %v551_v15  ;;  %984 = vpow2.f32 %v450_v0 }
 0x143   :  { %v364_v46 = vpop.xlane.xlu1 %363  ;;  %v340_v43 = vpop.xlane.xlu2 %339 }
 0x144   :  { %v414_v9 = vsub.f32 %v1522_v20, %v364_v46  ;;  %v406_v14 = vsub.f32 %v1509_v16, %v340_v43  ;;  %v388_v59 = vpop.xlane.xlu0 %387 }
 0x145   :  { %v422_v8 = vsub.f32 %v1529_v21, %v388_v59 }
 0x146   :  { %v468_v26 = vmul.f32 1.442695, %v414_v9 }
 0x147   :  { %v1695_v29 = vpop.eup %982  ;;  %v484_v58 = vmul.f32 1.442695, %v422_v8 }
 0x148   :  { %986 = vpow2.f32 %v468_v26  ;;  %v506_v33 = vsel %vm263_vm1, %v1695_v29, 0.0  ;;  %v1701_v39 = vpop.eup %984 }
 0x149   :  { %507 = vadd.xlane.f32.xlu2 %v506_v33  ;;  %988 = vpow2.f32 %v482_v34 }
 0x14b   :  { %v367_v38 = vpop.xlane.xlu2 %366  ;;  %v319_v63 = vpop.xlane.xlu1 %318 }
 0x14c   :  { %v415_v6 = vsub.f32 %v1556_v27, %v367_v38  ;;  %v399_v44 = vsub.f32 %v1531_v22, %v319_v63  ;;  %v527_v22 = vsel %vm263_vm1, %v1701_v39, 0.0  ;;  %v452_v27 = vmul.f32 1.442695, %v406_v14  ;;  %v343_v10 = vpop.xlane.xlu0 %342 }
 0x14d   :  { %v407_v19 = vsub.f32 %v1543_v23, %v343_v10 }
 0x14e   :  { %v1703_v20 = vpop.eup %986  ;;  %v470_v42 = vmul.f32 1.442695, %v415_v6  ;;  %v438_v45 = vmul.f32 1.442695, %v399_v44 }
 0x14f   :  { %v554_v52 = vsel %vm263_vm1, %v1703_v20, 0.0  ;;  %v1712_v16 = vpop.eup %988  ;;  %v454_v46 = vmul.f32 1.442695, %v407_v19 }
 0x150   :  { %990 = vpow2.f32 %v470_v42  ;;  %555 = vadd.xlane.f32.xlu1 %v554_v52  ;;  %v575_v13 = vsel %vm263_vm1, %v1712_v16, 0.0 }
 0x151   :  { %992 = vpow2.f32 %v438_v45  ;;  %528 = vadd.xlane.f32.xlu2 %v527_v22 }
 0x152   :  { %994 = vpow2.f32 %v452_v27 }
 0x153   :  { %v391_v55 = vpop.xlane.xlu1 %390  ;;  %996 = vpow2.f32 %v448_v62 }
 0x154   :  { %v423_v36 = vsub.f32 %v1563_v28, %v391_v55 }
 0x156   :  { %v1715_v7 = vpop.eup %990  ;;  %v486_v2 = vmul.f32 1.442695, %v423_v36 }
 0x157   :  { %v1717_v30 = vpop.eup %992  ;;  %v557_v28 = vsel %vm263_vm1, %v1715_v7, 0.0 }
 0x158   :  { %998 = vpow2.f32 %v486_v2  ;;  %576 = vadd.xlane.f32.xlu1 %v575_v13  ;;  %v509_v37 = vsel %vm263_vm1, %v1717_v30, 0.0  ;;  %v1726_v40 = vpop.eup %994 }
 0x159   :  { %510 = vadd.xlane.f32.xlu0 %v509_v37  ;;  %558 = vadd.xlane.f32.xlu2 %v557_v28  ;;  %v1728_v18 = vpop.eup %996  ;;  %1000 = vpow2.f32 %v484_v58  ;;  %v530_v57 = vsel %vm263_vm1, %v1726_v40, 0.0 }
 0x15a   :  { %v524_v15 = vsel %vm263_vm1, %v1728_v18, 0.0  ;;  %1002 = vpow2.f32 %v454_v46 }
 0x15e   :  { %v1730_v21 = vpop.eup %998 }
 0x15f   :  { %v581_v0 = vsel %vm263_vm1, %v1730_v21, 0.0  ;;  %v1739_v43 = vpop.eup %1000 }
 0x160   :  { %531 = vadd.xlane.f32.xlu1 %v530_v57  ;;  %v578_v9 = vsel %vm263_vm1, %v1739_v43, 0.0  ;;  %v1743_v23 = vpop.eup %1002 }
 0x161   :  { %525 = vadd.xlane.f32.xlu0 %v524_v15  ;;  %582 = vadd.xlane.f32.xlu2 %v581_v0  ;;  %v533_v1 = vsel %vm263_vm1, %v1743_v23, 0.0 }
 0x169   :  { %579 = vadd.xlane.f32.xlu0 %v578_v9 }
 0x171   :  { %534 = vadd.xlane.f32.xlu0 %v533_v1 }
 0x17c   :  { %v514_v26 = vpop.xlane.xlu1 %513 }
 0x17d   :  { %v490_v33 = vpop.xlane.xlu2 %489  ;;  %1004 = vrcp.f32 %v514_v26 }
 0x17e   :  { %1006 = vrcp.f32 %v490_v33 }
 0x183   :  { %v1005_v34 = vpop.eup %1004 }
 0x184   :  { %v1007_v38 = vpop.eup %1006  ;;  %v562_v63 = vpop.xlane.xlu0 %561  ;;  %v1748_v44 = vmul.f32 %v1005_v34, %v1588_v61 }
 0x185   :  { %v538_v6 = vpop.xlane.xlu1 %537  ;;  %1008 = vrcp.f32 %v562_v63  ;;  %v616_v14 = vmul.f32 %v1007_v38, %v1590_v3 }
 0x186   :  { %1010 = vrcp.f32 %v538_v6  ;;  %656 = vst.msk [vmem:[%s1962_s5 + $0x40] sm:$0xff] %vm263_vm1, %v1748_v44 }
 0x187   :  { %648 = vst.msk [vmem:[%s1962_s5] sm:$0xff] %vm263_vm1, %v616_v14 }
 0x18b   :  { %v1009_v42 = vpop.eup %1008  ;;  %v541_v48 = vpop.xlane.xlu2 %540 }
 0x18c   :  { %v1011_v45 = vpop.eup %1010  ;;  %v1761_v61 = vmul.f32 %v1009_v42, %v1600_v17  ;;  %1012 = vrcp.f32 %v541_v48  ;;  %v493_v3 = vpop.xlane.xlu0 %492 }
 0x18d   :  { %v632_v52 = vmul.f32 %v1011_v45, %v1598_v11  ;;  %1014 = vrcp.f32 %v493_v3 }
 0x18e   :  { %672 = vst.msk [vmem:[%s1962_s5 + $0xc0] sm:$0xff] %vm263_vm1, %v1761_v61 }
 0x18f   :  { %712 = vxpose.xlu2.b32.start [1/16] (narrow) %v632_v52, 8  ;;  %664 = vst.msk [vmem:[%s1962_s5 + $0x80] sm:$0xff] %vm263_vm1, %v632_v52 }
 0x192   :  { %v1013_v22 = vpop.eup %1012 }
 0x193   :  { %v1015_v17 = vpop.eup %1014  ;;  %v565_v27 = vpop.xlane.xlu2 %564  ;;  %v633_v62 = vmul.f32 %v1013_v22, %v1609_v32 }
 0x194   :  { %v496_v59 = vpop.xlane.xlu1 %495  ;;  %1016 = vrcp.f32 %v565_v27  ;;  %v517_v11 = vpop.xlane.xlu0 %516  ;;  %v617_v55 = vmul.f32 %v1015_v17, %v1612_v35 }
 0x195   :  { %1018 = vrcp.f32 %v496_v59  ;;  %665 = vst.msk [vmem:[%s1962_s5 + $0x88] sm:$0xff] %vm263_vm1, %v633_v62 }
 0x196   :  { %1020 = vrcp.f32 %v517_v11  ;;  %649 = vst.msk [vmem:[%s1962_s5 + $0x8] sm:$0xff] %vm263_vm1, %v617_v55 }
 0x197   :  { %713 = vxpose.xlu2.b32.cont [2/16] (narrow) %v633_v62, 8 }
 0x19a   :  { %680 = vxpose.xlu1.b32.start [1/16] (narrow) %v616_v14, 8  ;;  %v1017_v36 = vpop.eup %1016 }
 0x19b   :  { %v1019_v32 = vpop.eup %1018  ;;  %v520_v2 = vpop.xlane.xlu2 %519  ;;  %v1784_v35 = vmul.f32 %v1017_v36, %v1619_v54 }
 0x19c   :  { %v568_v8 = vpop.xlane.xlu1 %567  ;;  %v1021_v13 = vpop.eup %1020  ;;  %1022 = vrcp.f32 %v520_v2  ;;  %v618_v28 = vmul.f32 %v1019_v32, %v1622_v53 }
 0x19d   :  { %v544_v37 = vpop.xlane.xlu0 %543  ;;  %1024 = vrcp.f32 %v568_v8  ;;  %v1788_v58 = vmul.f32 %v1021_v13, %v1625_v60  ;;  %673 = vst.msk [vmem:[%s1962_s5 + $0xc8] sm:$0xff] %vm263_vm1, %v1784_v35 }
 0x19e   :  { %1026 = vrcp.f32 %v544_v37  ;;  %650 = vst.msk [vmem:[%s1962_s5 + $0x10] sm:$0xff] %vm263_vm1, %v618_v28 }
 0x19f   :  { %657 = vst.msk [vmem:[%s1962_s5 + $0x48] sm:$0xff] %vm263_vm1, %v1788_v58 }
 0x1a2   :  { %681 = vxpose.xlu1.b32.cont [2/16] (narrow) %v617_v55, 8  ;;  %v1023_v54 = vpop.eup %1022 }
 0x1a3   :  { %v1025_v53 = vpop.eup %1024  ;;  %v499_v60 = vpop.xlane.xlu2 %498  ;;  %v1805_v19 = vmul.f32 %v1023_v54, %v1637_v12 }
 0x1a4   :  { %v523_v10 = vpop.xlane.xlu1 %522  ;;  %v1027_v57 = vpop.eup %1026  ;;  %1028 = vrcp.f32 %v499_v60  ;;  %v1808_v0 = vmul.f32 %v1025_v53, %v1634_v41 }
 0x1a5   :  { %v571_v15 = vpop.xlane.xlu0 %570  ;;  %1030 = vrcp.f32 %v523_v10  ;;  %v634_v46 = vmul.f32 %v1027_v57, %v1640_v24  ;;  %658 = vst.msk [vmem:[%s1962_s5 + $0x50] sm:$0xff] %vm263_vm1, %v1805_v19 }
 0x1a6   :  { %1032 = vrcp.f32 %v571_v15  ;;  %674 = vst.msk [vmem:[%s1962_s5 + $0xd0] sm:$0xff] %vm263_vm1, %v1808_v0 }
 0x1a7   :  { %666 = vst.msk [vmem:[%s1962_s5 + $0x90] sm:$0xff] %vm263_vm1, %v634_v46  ;;  %714 = vxpose.xlu2.b32.cont [3/16] (narrow) %v634_v46, 8 }
 0x1aa   :  { %682 = vxpose.xlu1.b32.cont [3/16] (narrow) %v618_v28, 8  ;;  %v1029_v41 = vpop.eup %1028 }
 0x1ab   :  { %v1031_v12 = vpop.eup %1030  ;;  %v619_v1 = vmul.f32 %v1029_v41, %v1654_v47 }
 0x1ac   :  { %v550_v24 = vpop.xlane.xlu2 %549  ;;  %v547_v9 = vpop.xlane.xlu1 %546  ;;  %v1827_v34 = vmul.f32 %v1031_v12, %v1652_v31 }
 0x1ad   :  { %v1033_v26 = vpop.eup %1032  ;;  %1034 = vrcp.f32 %v550_v24  ;;  %v502_v33 = vpop.xlane.xlu0 %501  ;;  %651 = vst.msk [vmem:[%s1962_s5 + $0x18] sm:$0xff] %vm263_vm1, %v619_v1 }
 0x1ae   :  { %1036 = vrcp.f32 %v547_v9  ;;  %v1834_v38 = vmul.f32 %v1033_v26, %v1658_v50  ;;  %659 = vst.msk [vmem:[%s1962_s5 + $0x58] sm:$0xff] %vm263_vm1, %v1827_v34 }
 0x1af   :  { %1038 = vrcp.f32 %v502_v33 }
 0x1b0   :  { %675 = vst.msk [vmem:[%s1962_s5 + $0xd8] sm:$0xff] %vm263_vm1, %v1834_v38 }
 0x1b2   :  { %683 = vxpose.xlu1.b32.cont [4/16] (narrow) %v619_v1, 8 }
 0x1b3   :  { %v1035_v31 = vpop.eup %1034 }
 0x1b4   :  { %v1037_v47 = vpop.eup %1036  ;;  %v574_v63 = vpop.xlane.xlu2 %573  ;;  %v636_v50 = vmul.f32 %v1035_v31, %v1671_v51 }
 0x1b5   :  { %v505_v6 = vpop.xlane.xlu1 %504  ;;  %v1039_v14 = vpop.eup %1038  ;;  %1040 = vrcp.f32 %v574_v63  ;;  %v635_v45 = vmul.f32 %v1037_v47, %v1669_v56 }
 0x1b6   :  { %v553_v42 = vpop.xlane.xlu0 %552  ;;  %1042 = vrcp.f32 %v505_v6  ;;  %v620_v48 = vmul.f32 %v1039_v14, %v1666_v49  ;;  %668 = vst.msk [vmem:[%s1962_s5 + $0xa0] sm:$0xff] %vm263_vm1, %v636_v50 }
 0x1b7   :  { %1044 = vrcp.f32 %v553_v42  ;;  %715 = vxpose.xlu2.b32.cont [4/16] (narrow) %v635_v45, 8  ;;  %667 = vst.msk [vmem:[%s1962_s5 + $0x98] sm:$0xff] %vm263_vm1, %v635_v45 }
 0x1b8   :  { %652 = vst.msk [vmem:[%s1962_s5 + $0x20] sm:$0xff] %vm263_vm1, %v620_v48 }
 0x1ba   :  { %684 = vxpose.xlu1.b32.cont [5/16] (narrow) %v620_v48, 8 }
 0x1bb   :  { %v1041_v56 = vpop.eup %1040 }
 0x1bc   :  { %v1043_v49 = vpop.eup %1042  ;;  %v1862_v51 = vmul.f32 %v1041_v56, %v1680_v4  ;;  %v508_v52 = vpop.xlane.xlu2 %507 }
 0x1bd   :  { %v1045_v3 = vpop.eup %1044  ;;  %v621_v22 = vmul.f32 %v1043_v49, %v1682_v5  ;;  %1046 = vrcp.f32 %v508_v52 }
 0x1be   :  { %v637_v17 = vmul.f32 %v1045_v3, %v1687_v25  ;;  %676 = vst.msk [vmem:[%s1962_s5 + $0xe0] sm:$0xff] %vm263_vm1, %v1862_v51 }
 0x1bf   :  { %716 = vxpose.xlu2.b32.cont [5/16] (narrow) %v636_v50, 8  ;;  %653 = vst.msk [vmem:[%s1962_s5 + $0x28] sm:$0xff] %vm263_vm1, %v621_v22 }
 0x1c0   :  { %669 = vst.msk [vmem:[%s1962_s5 + $0xa8] sm:$0xff] %vm263_vm1, %v637_v17 }
 0x1c2   :  { %685 = vxpose.xlu1.b32.cont [6/16] (narrow) %v621_v22, 8 }
 0x1c3   :  { %v556_v4 = vpop.xlane.xlu1 %555  ;;  %v1047_v5 = vpop.eup %1046 }
 0x1c4   :  { %1048 = vrcp.f32 %v556_v4  ;;  %v529_v25 = vpop.xlane.xlu2 %528  ;;  %v622_v27 = vmul.f32 %v1047_v5, %v1695_v29 }
 0x1c5   :  { %1050 = vrcp.f32 %v529_v25 }
 0x1c6   :  { %654 = vst.msk [vmem:[%s1962_s5 + $0x30] sm:$0xff] %vm263_vm1, %v622_v27 }
 0x1c7   :  { %717 = vxpose.xlu2.b32.cont [6/16] (narrow) %v637_v17, 8 }
 0x1ca   :  { %v1049_v59 = vpop.eup %1048  ;;  %686 = vxpose.xlu1.b32.cont [7/16] (narrow) %v622_v27, 8 }
 0x1cb   :  { %v577_v62 = vpop.xlane.xlu1 %576  ;;  %v638_v11 = vmul.f32 %v1049_v59, %v1703_v20  ;;  %v1051_v55 = vpop.eup %1050 }
 0x1cc   :  { %v511_v36 = vpop.xlane.xlu0 %510  ;;  %1052 = vrcp.f32 %v577_v62  ;;  %v559_v32 = vpop.xlane.xlu2 %558  ;;  %v629_v29 = vmul.f32 %v1051_v55, %v1701_v39 }
 0x1cd   :  { %1054 = vrcp.f32 %v511_v36  ;;  %670 = vst.msk [vmem:[%s1962_s5 + $0xb0] sm:$0xff] %vm263_vm1, %v638_v11 }
 0x1ce   :  { %1056 = vrcp.f32 %v559_v32  ;;  %661 = vst.msk [vmem:[%s1962_s5 + $0x68] sm:$0xff] %vm263_vm1, %v629_v29 }
 0x1cf   :  { %718 = vxpose.xlu2.b32.cont [7/16] (narrow) %v638_v11, 8 }
 0x1d2   :  { %v1053_v20 = vpop.eup %1052 }
 0x1d3   :  { %v1055_v2 = vpop.eup %1054  ;;  %v532_v8 = vpop.xlane.xlu1 %531  ;;  %v645_v13 = vmul.f32 %v1053_v20, %v1712_v16 }
 0x1d4   :  { %v1057_v37 = vpop.eup %1056  ;;  %v526_v28 = vpop.xlane.xlu0 %525  ;;  %1058 = vrcp.f32 %v532_v8  ;;  %v623_v54 = vmul.f32 %v1055_v2, %v1717_v30 }
 0x1d5   :  { %1060 = vrcp.f32 %v526_v28  ;;  %v583_v53 = vpop.xlane.xlu2 %582  ;;  %v639_v39 = vmul.f32 %v1057_v37, %v1715_v7  ;;  %677 = vst.msk [vmem:[%s1962_s5 + $0xe8] sm:$0xff] %vm263_vm1, %v645_v13 }
 0x1d6   :  { %1062 = vrcp.f32 %v583_v53  ;;  %655 = vst.msk [vmem:[%s1962_s5 + $0x38] sm:$0xff] %vm263_vm1, %v623_v54  ;;  %687 = vxpose.xlu1.b32.cont [8/16] (narrow) %v623_v54, 8 }
 0x1d7   :  { %671 = vst.msk [vmem:[%s1962_s5 + $0xb8] sm:$0xff] %vm263_vm1, %v639_v39  ;;  %719 = vxpose.xlu2.b32.cont [8/16] (narrow) %v639_v39, 8 }
 0x1da   :  { %v1059_v16 = vpop.eup %1058 }
 0x1db   :  { %v1061_v7 = vpop.eup %1060  ;;  %v630_v30 = vmul.f32 %v1059_v16, %v1726_v40 }
 0x1dc   :  { %v1063_v60 = vpop.eup %1062  ;;  %v580_v10 = vpop.xlane.xlu0 %579  ;;  %v628_v57 = vmul.f32 %v1061_v7, %v1728_v18 }
 0x1dd   :  { %1064 = vrcp.f32 %v580_v10  ;;  %662 = vst.msk [vmem:[%s1962_s5 + $0x70] sm:$0xff] %vm263_vm1, %v630_v30  ;;  %v647_v15 = vmul.f32 %v1063_v60, %v1730_v21 }
 0x1de   :  { %688 = vxpose.xlu1.b32.cont [9/16] (narrow) %v1748_v44, 8  ;;  %660 = vst.msk [vmem:[%s1962_s5 + $0x60] sm:$0xff] %vm263_vm1, %v628_v57 }
 0x1df   :  { %720 = vxpose.xlu2.b32.cont [9/16] (narrow) %v1761_v61, 8  ;;  %679 = vst.msk [vmem:[%s1962_s5 + $0xf8] sm:$0xff] %vm263_vm1, %v647_v15  ;;  %v744_v61 = vlaneseq }
 0x1e3   :  { %v1065_v40 = vpop.eup %1064 }
 0x1e4   :  { %v535_v18 = vpop.xlane.xlu0 %534  ;;  %v646_v46 = vmul.f32 %v1065_v40, %v1739_v43 }
 0x1e5   :  { %1066 = vrcp.f32 %v535_v18 }
 0x1e6   :  { %689 = vxpose.xlu1.b32.cont [10/16] (narrow) %v1788_v58, 8  ;;  %678 = vst.msk [vmem:[%s1962_s5 + $0xf0] sm:$0xff] %vm263_vm1, %v646_v46 }
 0x1e7   :  { %721 = vxpose.xlu2.b32.cont [10/16] (narrow) %v1784_v35, 8 }
 0x1eb   :  { %v1067_v21 = vpop.eup %1066 }
 0x1ec   :  { %v631_v44 = vmul.f32 %v1067_v21, %v1743_v23 }
 0x1ee   :  { %690 = vxpose.xlu1.b32.cont [11/16] (narrow) %v1805_v19, 8  ;;  %663 = vst.msk [vmem:[%s1962_s5 + $0x78] sm:$0xff] %vm263_vm1, %v631_v44  ;;  %v745_v19 = vshrl.u32 %v744_v61, 7  ;;  %s1124_s5 = smov [#allocation4]  }
 0x1ef   :  { %722 = vxpose.xlu2.b32.cont [11/16] (narrow) %v1808_v0, 8  ;;  %s860_s28 = sshll.u32 %s1124_s5, 4  ;;  %s861_s28 = int_to_ptr.vmem [resolvable:$true] %s860_s28 }
 0x1f0   :  { %v746_v12 = vcvt.s32.f32 %v745_v19 }
 0x1f6   :  { %691 = vxpose.xlu1.b32.cont [12/16] (narrow) %v1827_v34, 8 }
 0x1f7   :  { %723 = vxpose.xlu2.b32.cont [12/16] (narrow) %v1834_v38, 8 }
 0x1fe   :  { %692 = vxpose.xlu1.b32.cont [13/16] (narrow) %v628_v57, 8 }
 0x1ff   :  { %724 = vxpose.xlu2.b32.cont [13/16] (narrow) %v1862_v51, 8 }
 0x206   :  { %693 = vxpose.xlu1.b32.cont [14/16] (narrow) %v629_v29, 8 }
 0x207   :  { %725 = vxpose.xlu2.b32.cont [14/16] (narrow) %v645_v13, 8 }
 0x20e   :  { %694 = vxpose.xlu1.b32.cont [15/16] (narrow) %v630_v30, 8 }
 0x20f   :  { %726 = vxpose.xlu2.b32.cont [15/16] (narrow) %v646_v46, 8 }
 0x216   :  { %695 = vxpose.xlu1.b32.end [16/16] (narrow) %v631_v44, 8 }
 0x217   :  { %727 = vxpose.xlu2.b32.end [16/16] (narrow) %v647_v15, 8 }
 0x238   :  { %v728_v43 = vpop.trf.xlu2 }
 0x239   :  { %v753_v23 = vrot.slane %v728_v43, 4 }
 0x23b   :  { %v754_v35 = vmax.f32 %v728_v43, %v753_v23 }
 0x23d   :  { %v755_v58 = vrot.slane %v754_v35, 2 }
 0x23f   :  { %v756_v0 = vmax.f32 %v754_v35, %v755_v58 }
 0x241   :  { %v757_v41 = vrot.slane %v756_v0, 1 }
 0x242   :  { %v696_v24 = vpop.trf.xlu1 }
 0x243   :  { %v758_v9 = vmax.f32 %v756_v0, %v757_v41  ;;  %v747_v1 = vrot.slane %v696_v24, 4 }
 0x245   :  { %vm760_vm2 = vcmp.eq.f32.partialorder %v728_v43, %v758_v9  ;;  %v748_v26 = vmax.f32 %v696_v24, %v747_v1 }
 0x246   :  { %v762_v33 = vsel %vm760_vm2, %v746_v12, 8.0 }
 0x247   :  { %v769_v34 = vrot.slane %v762_v33, 4  ;;  %v749_v38 = vrot.slane %v748_v26, 2 }
 0x249   :  { %v770_v31 = vmin.f32 %v762_v33, %v769_v34  ;;  %v750_v47 = vmax.f32 %v748_v26, %v749_v38 }
 0x24b   :  { %v771_v63 = vrot.slane %v770_v31, 2  ;;  %v751_v6 = vrot.slane %v750_v47, 1 }
 0x24d   :  { %v772_v50 = vmin.f32 %v770_v31, %v771_v63  ;;  %v752_v14 = vmax.f32 %v750_v47, %v751_v6 }
 0x24f   :  { %v773_v42 = vrot.slane %v772_v50, 1  ;;  %vm759_vm3 = vcmp.eq.f32.partialorder %v696_v24, %v752_v14 }
 0x250   :  { %v761_v45 = vsel %vm759_vm3, %v746_v12, 8.0 }
 0x251   :  { %v774_v48 = vmin.f32 %v772_v50, %v773_v42  ;;  %v763_v56 = vrot.slane %v761_v45, 4 }
 0x253   :  { %vm776_vm4 = vcmp.eq.f32.partialorder %v746_v12, %v774_v48  ;;  %v764_v49 = vmin.f32 %v761_v45, %v763_v56 }
 0x254   :  { %v778_v51 = vsel %vm776_vm4, -1.0, %v728_v43 }
 0x255   :  { %v785_v3 = vrot.slane %v778_v51, 4  ;;  %v765_v52 = vrot.slane %v764_v49, 2 }
 0x257   :  { %v786_v22 = vmax.f32 %v778_v51, %v785_v3  ;;  %v766_v17 = vmin.f32 %v764_v49, %v765_v52 }
 0x259   :  { %v787_v4 = vrot.slane %v786_v22, 2  ;;  %v767_v5 = vrot.slane %v766_v17, 1 }
 0x25b   :  { %v788_v25 = vmax.f32 %v786_v22, %v787_v4  ;;  %v768_v27 = vmin.f32 %v766_v17, %v767_v5 }
 0x25d   :  { %v789_v59 = vrot.slane %v788_v25, 1  ;;  %vm775_vm5 = vcmp.eq.f32.partialorder %v746_v12, %v768_v27 }
 0x25e   :  { %v777_v62 = vsel %vm775_vm5, -1.0, %v696_v24 }
 0x25f   :  { %v790_v11 = vmax.f32 %v788_v25, %v789_v59  ;;  %v779_v55 = vrot.slane %v777_v62, 4 }
 0x261   :  { %vm792_vm8 = vcmp.eq.f32.partialorder %v778_v51, %v790_v11  ;;  %v780_v36 = vmax.f32 %v777_v62, %v779_v55  ;;  %v809_v32 = vsel %vm807_vm6, %v758_v9, %v790_v11 }
 0x262   :  { %v794_v29 = vsel %vm792_vm8, %v746_v12, 8.0  ;;  %v820_v20 = vsel %vm812_vm7, %v809_v32, 0.0 }
 0x263   :  { %v801_v2 = vrot.slane %v794_v29, 4  ;;  %v781_v8 = vrot.slane %v780_v36, 2  ;;  %v821_v13 = vrot.slane %v820_v20, 4 }
 0x265   :  { %v802_v37 = vmin.f32 %v794_v29, %v801_v2  ;;  %v782_v28 = vmax.f32 %v780_v36, %v781_v8  ;;  %v822_v54 = vadd.f32 %v821_v13, %v820_v20 }
 0x267   :  { %v803_v53 = vrot.slane %v802_v37, 2  ;;  %v783_v39 = vrot.slane %v782_v28, 1  ;;  %v823_v16 = vrot.slane %v822_v54, 2 }
 0x269   :  { %v804_v7 = vmin.f32 %v802_v37, %v803_v53  ;;  %v784_v30 = vmax.f32 %v782_v28, %v783_v39  ;;  %v824_v60 = vadd.f32 %v823_v16, %v822_v54 }
 0x26b   :  { %v805_v10 = vrot.slane %v804_v7, 1  ;;  %vm791_vm9 = vcmp.eq.f32.partialorder %v777_v62, %v784_v30  ;;  %v808_v57 = vsel %vm807_vm6, %v752_v14, %v784_v30  ;;  %v825_v15 = vrot.slane %v824_v60, 1 }
 0x26c   :  { %v793_v40 = vsel %vm791_vm9, %v746_v12, 8.0  ;;  %v813_v18 = vsel %vm812_vm7, %v808_v57, 0.0 }
 0x26d   :  { %v806_v46 = vmin.f32 %v804_v7, %v805_v10  ;;  %v795_v21 = vrot.slane %v793_v40, 4  ;;  %v814_v44 = vrot.slane %v813_v18, 4  ;;  %v826_v43 = vadd.f32 %v825_v15, %v824_v60 }
 0x26f   :  { %v811_v23 = vsel %vm807_vm6, %v774_v48, %v806_v46  ;;  %v796_v61 = vmin.f32 %v793_v40, %v795_v21  ;;  %v815_v35 = vadd.f32 %v814_v44, %v813_v18  ;;  %v828_v0 = vadd.f32 1e-06, %v826_v43 }
 0x270   :  { %v934_v41 = vceil.f32 %v811_v23  ;;  %v935_v24 = vfloor.f32 %v811_v23  ;;  %vm933_vm10 = vcmp.lt.s32.totalorder %v811_v23, 0 }
 0x271   :  { %v797_v58 = vrot.slane %v796_v61, 2  ;;  %v816_v19 = vrot.slane %v815_v35, 2  ;;  %1068 = vrcp.f32 %v828_v0 }
 0x272   :  { %v936_v33 = vsel %vm933_vm10, %v934_v41, %v935_v24 }
 0x273   :  { %v798_v9 = vmin.f32 %v796_v61, %v797_v58  ;;  %v817_v1 = vadd.f32 %v816_v19, %v815_v35  ;;  %v937_v63 = vcvt.f32.s32 %v936_v33 }
 0x275   :  { %v799_v26 = vrot.slane %v798_v9, 1  ;;  %v818_v12 = vrot.slane %v817_v1, 1  ;;  %v841_v48 = vrot.slane %v937_v63, 6 }
 0x277   :  { %v800_v34 = vmin.f32 %v798_v9, %v799_v26  ;;  %v819_v38 = vadd.f32 %v818_v12, %v817_v1  ;;  %v1069_v14 = vpop.eup %1068 }
 0x278   :  { %v832_v56 = vmul.f32 %v1069_v14, %v809_v32 }
 0x279   :  { %v810_v31 = vsel %vm807_vm6, %v768_v27, %v800_v34  ;;  %v827_v47 = vadd.f32 1e-06, %v819_v38 }
 0x27a   :  { %vm928_vm11 = vcmp.lt.s32.totalorder %v810_v31, 0  ;;  %v929_v6 = vceil.f32 %v810_v31  ;;  %v930_v50 = vfloor.f32 %v810_v31  ;;  %v835_v52 = vrot.slane %v832_v56, 6 }
 0x27b   :  { %1070 = vrcp.f32 %v827_v47 }
 0x27c   :  { %v931_v42 = vsel %vm928_vm11, %v929_v6, %v930_v50 }
 0x27d   :  { %v932_v45 = vcvt.f32.s32 %v931_v42 }
 0x27f   :  { %v842_v49 = vsel %vm812_vm7, %v932_v45, %v841_v48 }
 0x280   :  { %843 = vst [vmem:[#allocation4] sm:$0xf] %v842_v49 }
 0x281   :  { %v1071_v51 = vpop.eup %1070  ;;  %865 = dma.vmem_to_hbm [thread:$0]  %s861_s28, 64, %s863_s6, [#allocation5]  }
 0x282   :  { %v831_v3 = vmul.f32 %v1071_v51, %v808_v57 }
 0x284   :  { %v836_v22 = vsel %vm812_vm7, %v831_v3, %v835_v52 }
 0x285   :  { %838 = vst [vmem:[#allocation2] sm:$0xf] %v836_v22 }
 0x286   :  { %854 = dma.vmem_to_hbm [thread:$0]  %s850_s7, 64, %s852_s10, [#allocation3]  }
 0x287   :  { %1120 = dma.done.wait [#allocation3], 64  }
 0x288   :  { %1121 = vsyncadd [#allocation3], 4294967232 }
 0x289   :  { %1122 = dma.done.wait [#allocation5], 64  }
 0x28a   :  { %1123 = vsyncadd [#allocation5], 4294967232 }
 0x28b   :  { %882 = vsyncpa [#allocation3], 1 }
 0x28c   :  { %883 = vsyncpa [#allocation5], 1 }

</bundles_post_ra>
